<compile_context>
chip_gen: v7x
topology: tpu7x:2x2x1
jax: 0.10.0
libtpu: 0.0.40
codegen_flags: <defaults>
</compile_context>

<pallas_src>
import jax
import jax.numpy as jnp
from jax.experimental import pallas as pl
from jax.experimental.pallas import tpu as pltpu


NUM_CLASSES = 10
HIDDEN = 16          # fc1 output width (folded projection width)
HID_PAD = 128        # lane-dense padded hidden width
OUT_PAD = 128        # lane-dense output slab width


def _round_up(x, m):
    return ((x + m - 1) // m) * m


def fusion2_kernel(x_ref, wm_ref, bm_ref, w2_ref, b2_ref, out_ref):
    # x_ref:  (TM, D)           bf16   flattened input tile (pipelined)
    # wm_ref: (D, HID_PAD)      bf16   folded (sub-models ++ fc1), zero-padded
    # bm_ref: (1, HID_PAD)      f32    folded bias, zero-padded
    # w2_ref: (HID_PAD, OUT_PAD) f32   fc2 weight, zero-padded both dims
    # b2_ref: (1, OUT_PAD)      f32    fc2 bias, zero-padded
    # out_ref:(TM, OUT_PAD)     f32    lane-dense output slab
    feats = jnp.dot(x_ref[...], wm_ref[...],
                    preferred_element_type=jnp.float32)      # MXU, bf16 in / f32 acc
    h = jnp.maximum(feats + bm_ref[...], 0.0)                # fc1 bias + ReLU (f32 VPU)
    out = jnp.dot(h, w2_ref[...],
                  preferred_element_type=jnp.float32)        # fc2 (tiny, f32 MXU)
    out_ref[...] = out + b2_ref[...]


def fuse_params(params):
    """Fold fc1 into the sub-model projection; pad everything lane-dense."""
    wm, bm, w1, b1, w2, b2 = params
    d_in = wm.shape[0]
    wm_fused = jnp.dot(wm, w1)                                 # [D, 16] f32
    bm_fused = jnp.dot(bm, w1) + b1                            # [1, 16] f32

    wm_pad = (jnp.zeros((d_in, HID_PAD), jnp.float32)
              .at[:, :HIDDEN].set(wm_fused).astype(jnp.bfloat16))
    bm_pad = (jnp.zeros((1, HID_PAD), jnp.float32)
              .at[:, :HIDDEN].set(bm_fused))
    w2_pad = (jnp.zeros((HID_PAD, OUT_PAD), jnp.float32)
              .at[:HIDDEN, :NUM_CLASSES].set(w2))
    b2_pad = (jnp.zeros((1, OUT_PAD), jnp.float32)
              .at[:, :NUM_CLASSES].set(b2))
    return wm_pad, bm_pad, w2_pad, b2_pad


def fusion2_forward(x_nchw, fused_params):
    """x_nchw: [B, C, H, W] float32.  Returns [B, 10] float32."""
    wm_pad, bm_pad, w2_pad, b2_pad = fused_params
    B = x_nchw.shape[0]
    D = wm_pad.shape[0]

    x_flat = x_nchw.reshape(B, -1)                    # glue: NCHW -> [B, D]

    # Batch tile: multiple of 8 sublanes, cap at 512.  VMEM use:
    # 2 bufs * 512 * D * 2B (x) + 2 bufs * 512 * 128 * 4B (out) + resident
    # weights (~D*128*2B) — comfortably under the v7x 64 MiB budget for any
    # realistic D here.
    TM = 512 if B >= 512 else _round_up(B, 8)
    B_pad = _round_up(B, TM)
    if B_pad != B:
        x_flat = jnp.pad(x_flat, ((0, B_pad - B), (0, 0)))
    x_bf16 = x_flat.astype(jnp.bfloat16)              # halve HBM bytes for x

    grid = (pl.cdiv(B_pad, TM),)

    cost = pl.CostEstimate(
        flops=2 * B_pad * D * HID_PAD + 2 * B_pad * HID_PAD * OUT_PAD,
        transcendentals=0,
        bytes_accessed=(B_pad * D * 2                 # x (bf16)
                        + D * HID_PAD * 2             # wm (bf16)
                        + HID_PAD * OUT_PAD * 4 + OUT_PAD * 4 + HID_PAD * 4
                        + B_pad * OUT_PAD * 4),       # output slab
    )

    out_pad = pl.pallas_call(
        fusion2_kernel,
        out_shape=jax.ShapeDtypeStruct((B_pad, OUT_PAD), jnp.float32),
        grid_spec=pltpu.PrefetchScalarGridSpec(
            num_scalar_prefetch=0,
            grid=grid,
            in_specs=[
                pl.BlockSpec((TM, D), lambda i: (i, 0)),            # x tile (pipelined)
                pl.BlockSpec((D, HID_PAD), lambda i: (0, 0)),       # resident weights
                pl.BlockSpec((1, HID_PAD), lambda i: (0, 0)),
                pl.BlockSpec((HID_PAD, OUT_PAD), lambda i: (0, 0)),
                pl.BlockSpec((1, OUT_PAD), lambda i: (0, 0)),
            ],
            out_specs=pl.BlockSpec((TM, OUT_PAD), lambda i: (i, 0)),
        ),
        compiler_params=pltpu.CompilerParams(
            dimension_semantics=("parallel",)),
        cost_estimate=cost,
    )(x_bf16, wm_pad, bm_pad, w2_pad, b2_pad)

    return out_pad[:B, :NUM_CLASSES]


def make_params(key, d_in):
    """Deterministic synthetic parameters matching the module's shapes."""
    ks = jax.random.split(key, 6)
    # 4 synthetic sub-models, each D -> 10, concatenated to a single [D, 40].
    wm = (jax.random.normal(ks[0], (d_in, 40), jnp.float32) *
          (1.0 / jnp.sqrt(d_in)))
    bm = jax.random.normal(ks[1], (1, 40), jnp.float32) * 0.01
    # fc1: Linear(40, 16)  -> stored as [40, 16] (x @ W)
    w1 = jax.random.normal(ks[2], (40, 16), jnp.float32) * (1.0 / jnp.sqrt(40))
    b1 = jax.random.normal(ks[3], (1, 16), jnp.float32) * 0.01
    # fc2: Linear(16, 10)  -> stored as [16, 10]
    w2 = jax.random.normal(ks[4], (16, 10), jnp.float32) * (1.0 / jnp.sqrt(16))
    b2 = jax.random.normal(ks[5], (1, 10), jnp.float32) * 0.01
    return (wm, bm, w1, b1, w2, b2)


def reference_original(x_nchw, params):
    """Original module semantics (unfused, f32): concat -> fc1 -> relu -> fc2."""
    wm, bm, w1, b1, w2, b2 = params
    x = x_nchw.reshape(x_nchw.shape[0], -1)
    feats = x @ wm + bm                      # cat(model1..4(x)) -> [B, 40]
    h = jnp.maximum(feats @ w1 + b1, 0.0)    # fc1 + relu
    return h @ w2 + b2                       # fc2


def reference_fused(x_nchw, fused_params):
    """Same math as the kernel (fold + pad + bf16 MXU operands), in plain JAX."""
    wm_pad, bm_pad, w2_pad, b2_pad = fused_params
    x = x_nchw.reshape(x_nchw.shape[0], -1).astype(jnp.bfloat16)
    feats = jnp.dot(x, wm_pad, preferred_element_type=jnp.float32) + bm_pad
    h = jnp.maximum(feats, 0.0)
    out = jnp.dot(h, w2_pad, preferred_element_type=jnp.float32) + b2_pad
    return out[:, :NUM_CLASSES]


if __name__ == "__main__":
    key = jax.random.PRNGKey(0)
    k_x, k_p = jax.random.split(key)

    B, C, H, W = 2, 4, 16, 16
    x = jax.random.normal(k_x, (B, C, H, W), jnp.float32)
    params = make_params(k_p, C * H * W)
    fused = fuse_params(params)

    out = fusion2_forward(x, fused)
    out = jax.block_until_ready(out)
    assert out.shape == (B, NUM_CLASSES), out.shape

    # Strict check vs. a reference that uses the same fold / pad / bf16 ops.
    ref_exact = reference_fused(x, fused)
    assert jnp.allclose(out, ref_exact, atol=1e-3, rtol=1e-3), (
        "mismatch vs fused reference")

    # Semantic check vs. the original (unfused, f32) module math; tolerance
    # accounts for the bf16 cast of the mem-bound MXU operands.
    ref_orig = reference_original(x, params)
    assert jnp.allclose(out, ref_orig, atol=5e-2, rtol=5e-2), (
        "mismatch vs original-semantics reference")

    print("KERNEL_OK")
</pallas_src>

<mosaic_0001>
module attributes {stable_mosaic.version = 11 : i64} {
  func.func @fusion2_kernel(%arg0: i32, %arg1: memref<8x1024xbf16, #tpu.memory_space<vmem>>, %arg2: memref<1024x128xbf16, #tpu.memory_space<vmem>>, %arg3: memref<1x128xf32, #tpu.memory_space<vmem>>, %arg4: memref<128x128xf32, #tpu.memory_space<vmem>>, %arg5: memref<1x128xf32, #tpu.memory_space<vmem>>, %arg6: memref<8x128xf32, #tpu.memory_space<vmem>>) attributes {dimension_semantics = [#tpu.dimension_semantics<parallel>], iteration_bounds = array<i64: 1>, scalar_prefetch = 0 : i64, scratch_operands = 0 : i64, tpu.core_type = #tpu.core_type<tc>, window_params = [{transform_indices = @transform_0, window_bounds = array<i64: 8, 1024>}, {pipeline_mode = #tpu.pipeline_mode<synchronous>, transform_indices = @transform_1, window_bounds = array<i64: 1024, 128>}, {pipeline_mode = #tpu.pipeline_mode<synchronous>, transform_indices = @transform_2, window_bounds = array<i64: 1, 128>}, {pipeline_mode = #tpu.pipeline_mode<synchronous>, transform_indices = @transform_3, window_bounds = array<i64: 128, 128>}, {pipeline_mode = #tpu.pipeline_mode<synchronous>, transform_indices = @transform_4, window_bounds = array<i64: 1, 128>}, {transform_indices = @transform_5, window_bounds = array<i64: 8, 128>}]} {
    %c0 = arith.constant 0 : index
    %c0_0 = arith.constant 0 : index
    %0 = vector.load %arg1[%c0, %c0_0] : memref<8x1024xbf16, #tpu.memory_space<vmem>>, vector<8x1024xbf16>
    %c0_1 = arith.constant 0 : index
    %c0_2 = arith.constant 0 : index
    %1 = vector.load %arg2[%c0_1, %c0_2] : memref<1024x128xbf16, #tpu.memory_space<vmem>>, vector<1024x128xbf16>
    %cst = arith.constant dense<0.000000e+00> : vector<8x128xf32>
    %2 = tpu.matmul %0, %1, %cst {dimension_numbers = #tpu.dot_dimension_numbers<[1], [0], [0], [1], [0, 0, 1, 1], [], []>} : vector<8x1024xbf16>, vector<1024x128xbf16>, vector<8x128xf32> -> vector<8x128xf32>
    %c0_3 = arith.constant 0 : index
    %c0_4 = arith.constant 0 : index
    %3 = vector.load %arg3[%c0_3, %c0_4] : memref<1x128xf32, #tpu.memory_space<vmem>>, vector<1x128xf32>
    %4 = vector.broadcast %3 : vector<1x128xf32> to vector<8x128xf32>
    %5 = arith.addf %2, %4 : vector<8x128xf32>
    %cst_5 = arith.constant 0.000000e+00 : f32
    %6 = vector.broadcast %cst_5 : f32 to vector<8x128xf32>
    %7 = arith.maximumf %5, %6 : vector<8x128xf32>
    %c0_6 = arith.constant 0 : index
    %c0_7 = arith.constant 0 : index
    %8 = vector.load %arg4[%c0_6, %c0_7] : memref<128x128xf32, #tpu.memory_space<vmem>>, vector<128x128xf32>
    %cst_8 = arith.constant dense<0.000000e+00> : vector<8x128xf32>
    %9 = tpu.matmul %7, %8, %cst_8 {dimension_numbers = #tpu.dot_dimension_numbers<[1], [0], [0], [1], [0, 0, 1, 1], [], []>} : vector<8x128xf32>, vector<128x128xf32>, vector<8x128xf32> -> vector<8x128xf32>
    %c0_9 = arith.constant 0 : index
    %c0_10 = arith.constant 0 : index
    %10 = vector.load %arg5[%c0_9, %c0_10] : memref<1x128xf32, #tpu.memory_space<vmem>>, vector<1x128xf32>
    %11 = vector.broadcast %10 : vector<1x128xf32> to vector<8x128xf32>
    %12 = arith.addf %9, %11 : vector<8x128xf32>
    %c0_11 = arith.constant 0 : index
    %c0_12 = arith.constant 0 : index
    %13 = vector.load %arg6[%c0_11, %c0_12] : memref<8x128xf32, #tpu.memory_space<vmem>>, vector<8x128xf32>
    tpu.vector_store %arg6[%c0_11, %c0_12], %12 {strides = array<i32>} : memref<8x128xf32, #tpu.memory_space<vmem>>, vector<8x128xf32>,
    return
  }
  func.func @transform_0(%arg0: i32) -> (i32, i32) {
    %c0_i32 = arith.constant 0 : i32
    %c0_i32_0 = arith.constant 0 : i32
    return %arg0, %c0_i32 : i32, i32
  }
  func.func @transform_1(%arg0: i32) -> (i32, i32) {
    %c0_i32 = arith.constant 0 : i32
    %c0_i32_0 = arith.constant 0 : i32
    %c0_i32_1 = arith.constant 0 : i32
    return %c0_i32, %c0_i32_0 : i32, i32
  }
  func.func @transform_2(%arg0: i32) -> (i32, i32) {
    %c0_i32 = arith.constant 0 : i32
    %c0_i32_0 = arith.constant 0 : i32
    %c0_i32_1 = arith.constant 0 : i32
    return %c0_i32, %c0_i32_0 : i32, i32
  }
  func.func @transform_3(%arg0: i32) -> (i32, i32) {
    %c0_i32 = arith.constant 0 : i32
    %c0_i32_0 = arith.constant 0 : i32
    %c0_i32_1 = arith.constant 0 : i32
    return %c0_i32, %c0_i32_0 : i32, i32
  }
  func.func @transform_4(%arg0: i32) -> (i32, i32) {
    %c0_i32 = arith.constant 0 : i32
    %c0_i32_0 = arith.constant 0 : i32
    %c0_i32_1 = arith.constant 0 : i32
    return %c0_i32, %c0_i32_0 : i32, i32
  }
  func.func @transform_5(%arg0: i32) -> (i32, i32) {
    %c0_i32 = arith.constant 0 : i32
    %c0_i32_0 = arith.constant 0 : i32
    return %arg0, %c0_i32 : i32, i32
  }
}

</mosaic_0001>

<bundles_post_ra>
// kernel: tpu_custom_call.1
= control target key start
LH: loop header
LB: loop body
LE: loop exit
PB: predicated region body
PF: predicated region fallthrough
CT: control target
= control target key end

     0   :  { %10 = vsyncpa [#allocation3], 0  ;;  %s1393_s0 = inlined_call_operand.hbm [shape: bf16[8,1024], index: 0, kind: input, shape index: {}]   ;;  %s1394_s1 = inlined_call_operand.hbm [shape: bf16[1024,128], index: 1, kind: input, shape index: {}]   ;;  %s1395_s2 = inlined_call_operand.vmem [shape: f32[1,128], index: 2, kind: input, shape index: {}]   ;;  %s1396_s3 = inlined_call_operand.hbm [shape: f32[128,128], index: 3, kind: input, shape index: {}]   ;;  %s1397_s4 = inlined_call_operand.vmem [shape: f32[1,128], index: 4, kind: input, shape index: {}]   ;;  %s1398_s5 = inlined_call_operand.hbm [shape: f32[8,128], index: 5, kind: output, shape index: {}]  }
   0x1   :  { %11 = vsyncpa [#allocation6], 0 }
   0x2   :  { %12 = vsyncpa [#allocation4], 0  ;;  %s1298_s18 = smov [#allocation5]   ;;  %s1204_s22 = scalar_lea.hbm %s1394_s1, 8192 }
   0x3   :  { %s28_s19 = sshll.u32 %s1298_s18, 4  ;;  %p1205_p0 = scmp.ne.s32.totalorder %s1394_s1, %s1204_s22  ;;  %s29_s19 = int_to_ptr.vmem [resolvable:$true] %s28_s19 }
   0x4   :  { %p1208_p1 = scmp.lt.u32.totalorder %s1204_s22, %s1394_s1 }
   0x6   :  { %p1210_p2 = pnand %p1208_p1, %p1205_p0 }
   0x8   :  { %1213 = shalt.err (!%p1210_p2)
}
   0x9   :  { %s1214_s27 = scalar_lea.vmem %s29_s19, 8192  ;;  %p1219_p4 = scmp.lt.s32.totalorder %s29_s19, %s29_s19 }
   0xa   :  { %p1215_p3 = scmp.ne.s32.totalorder %s29_s19, %s1214_s27  ;;  %p1220_p5 = scmp.lt.s32.totalorder %s1214_s27, %s1214_s27 }
   0xc   :  { %p1221_p6 = por %p1220_p5, %p1219_p4 }
   0xe   :  { %p1222_p7 = pnand %p1221_p6, %p1215_p3 }
  0x10   :  { %1225 = shalt.err (!%p1222_p7)
}
  0x11   :  { %s1299_s28 = smov 64   ;;  %s1300_s29 = smov 4  }
  0x12   :  { %34 = dma.hbm_to_vmem [thread:$0]  %s1394_s1, 8192, %s29_s19, [#allocation6], %s1299_s28, %s1299_s28, %s1300_s29  }
  0x13   :  { %s1301_s7 = smov [#allocation2]   ;;  %s1302_s9 = smov [#allocation7]  }
  0x14   :  { %s19_s8 = sshll.u32 %s1301_s7, 4  ;;  %s42_s10 = sshll.u32 %s1302_s9, 4  ;;  %s20_s8 = int_to_ptr.vmem [resolvable:$true] %s19_s8  ;;  %s43_s10 = int_to_ptr.vmem [resolvable:$true] %s42_s10 }
  0x15   :  { %s1226_s13 = scalar_lea.hbm %s1393_s0, 512 }
  0x16   :  { %p1227_p8 = scmp.ne.s32.totalorder %s1393_s0, %s1226_s13  ;;  %p1230_p9 = scmp.lt.u32.totalorder %s1226_s13, %s1393_s0 }
  0x18   :  { %p1232_p10 = pnand %p1230_p9, %p1227_p8 }
  0x1a   :  { %1235 = shalt.err (!%p1232_p10)
}
  0x1b   :  { %s1236_s1 = scalar_lea.vmem %s20_s8, 512  ;;  %p1241_p12 = scmp.lt.s32.totalorder %s20_s8, %s20_s8 }
  0x1c   :  { %p1237_p11 = scmp.ne.s32.totalorder %s20_s8, %s1236_s1  ;;  %p1242_p13 = scmp.lt.s32.totalorder %s1236_s1, %s1236_s1 }
  0x1e   :  { %p1243_p0 = por %p1242_p13, %p1241_p12 }
  0x20   :  { %p1244_p1 = pnand %p1243_p0, %p1237_p11 }
  0x22   :  { %1247 = shalt.err (!%p1244_p1)
}
  0x23   :  { %22 = dma.hbm_to_vmem [thread:$0]  %s1393_s0, 512, %s20_s8, [#allocation3]  }
  0x24   :  { %s1248_s22 = scalar_lea.hbm %s1396_s3, 2048 }
  0x25   :  { %p1249_p2 = scmp.ne.s32.totalorder %s1396_s3, %s1248_s22  ;;  %p1252_p3 = scmp.lt.u32.totalorder %s1248_s22, %s1396_s3 }
  0x27   :  { %p1254_p4 = pnand %p1252_p3, %p1249_p2 }
  0x29   :  { %1257 = shalt.err (!%p1254_p4)
}
  0x2a   :  { %s1258_s27 = scalar_lea.vmem %s43_s10, 2048  ;;  %p1263_p6 = scmp.lt.s32.totalorder %s43_s10, %s43_s10 }
  0x2b   :  { %p1259_p5 = scmp.ne.s32.totalorder %s43_s10, %s1258_s27  ;;  %p1264_p7 = scmp.lt.s32.totalorder %s1258_s27, %s1258_s27 }
  0x2d   :  { %p1265_p8 = por %p1264_p7, %p1263_p6 }
  0x2f   :  { %p1266_p9 = pnand %p1265_p8, %p1259_p5 }
  0x31   :  { %1269 = shalt.err (!%p1266_p9)
}
  0x32   :  { %s1303_s0 = smov 128   ;;  %s1304_s28 = smov 8  }
  0x33   :  { %48 = dma.hbm_to_vmem [thread:$0]  %s1396_s3, 2048, %s43_s10, [#allocation6], %s1303_s0, %s1303_s0, %s1304_s28  }
  0x34   :  { %1292 = dma.done.wait [#allocation3], 512  }
  0x35   :  { %1293 = vsyncadd [#allocation3], 4294966784 }
  0x36   :  { %1294 = dma.done.wait [#allocation6], 10240  }
  0x37   :  { %1295 = vsyncadd [#allocation6], 4294957056  ;;  %v1132_v0 = vld [vmem:[#allocation5 + $0x40] sm:$0xff]   ;;  %v1136_v4 = vld [vmem:[#allocation5 + $0x48] sm:$0xff]   ;;  %vm1306_vm0 = vmmov 0   ;;  %s1308_s8 = smov [#allocation8]  }
  0x38   :  { %v1133_v1 = vld [vmem:[#allocation5 + $0xc0] sm:$0xff]   ;;  %957 = vmatprep.subr.bf16.mxu0 %v1132_v0  ;;  %v1137_v5 = vld [vmem:[#allocation5 + $0xc8] sm:$0xff]   ;;  %v1140_v8 = vld [vmem:[#allocation5 + $0x50] sm:$0xff]   ;;  %s873_s9 = sshll.u32 %s1308_s8, 4  ;;  %s874_s9 = int_to_ptr.vmem [resolvable:$true] %s873_s9 }
  0x39   :  { %v1134_v2 = vld [vmem:[#allocation5] sm:$0xff]   ;;  %979 = vmatprep.subr.bf16.mxu1 %v1133_v1  ;;  %v1138_v6 = vld [vmem:[#allocation5 + $0x8] sm:$0xff]   ;;  %v1141_v9 = vld [vmem:[#allocation5 + $0xd0] sm:$0xff]   ;;  %s1270_s10 = scalar_lea.vmem %s874_s9, 128  ;;  %p1275_p11 = scmp.lt.s32.totalorder %s874_s9, %s874_s9 }
  0x3a   :  { %v1135_v3 = vld [vmem:[#allocation5 + $0x80] sm:$0xff]   ;;  %958 = vmatpush3.bf16.msra.mxu0 %v1134_v2  ;;  %v1139_v7 = vld [vmem:[#allocation5 + $0x88] sm:$0xff]   ;;  %v1142_v10 = vld [vmem:[#allocation5 + $0x10] sm:$0xff]   ;;  %p1271_p10 = scmp.ne.s32.totalorder %s874_s9, %s1270_s10  ;;  %p1276_p12 = scmp.lt.s32.totalorder %s1270_s10, %s1270_s10 }
  0x3b   :  { %980 = vmatpush3.bf16.msra.mxu1 %v1135_v3  ;;  %959 = vmatprep.subr.bf16.mxu0 %v1136_v4  ;;  %v1143_v11 = vld [vmem:[#allocation5 + $0x90] sm:$0xff]   ;;  %v1144_v12 = vld [vmem:[#allocation5 + $0x58] sm:$0xff]   ;;  %v1148_v16 = vld [vmem:[#allocation5 + $0x60] sm:$0xff]  }
  0x3c   :  { %981 = vmatprep.subr.bf16.mxu1 %v1137_v5  ;;  %v1145_v13 = vld [vmem:[#allocation5 + $0xd8] sm:$0xff]   ;;  %v1149_v17 = vld [vmem:[#allocation5 + $0xe0] sm:$0xff]   ;;  %v1152_v20 = vld [vmem:[#allocation5 + $0x68] sm:$0xff]   ;;  %p1277_p13 = por %p1276_p12, %p1275_p11 }
  0x3d   :  { %v1146_v14 = vld [vmem:[#allocation5 + $0x18] sm:$0xff]   ;;  %v1150_v18 = vld [vmem:[#allocation5 + $0x20] sm:$0xff]   ;;  %v1153_v21 = vld [vmem:[#allocation5 + $0xe8] sm:$0xff]  }
  0x3e   :  { %960 = vmatpush3.bf16.msra.mxu0 %v1138_v6  ;;  %v1147_v15 = vld [vmem:[#allocation5 + $0x98] sm:$0xff]   ;;  %v1151_v19 = vld [vmem:[#allocation5 + $0xa0] sm:$0xff]   ;;  %v1154_v22 = vld [vmem:[#allocation5 + $0x28] sm:$0xff]   ;;  %p1278_p0 = pnand %p1277_p13, %p1271_p10 }
  0x3f   :  { %982 = vmatpush3.bf16.msra.mxu1 %v1139_v7  ;;  %961 = vmatprep.subr.bf16.mxu0 %v1140_v8  ;;  %v1155_v23 = vld [vmem:[#allocation5 + $0xa8] sm:$0xff]   ;;  %v1156_v24 = vld [vmem:[#allocation5 + $0x70] sm:$0xff]   ;;  %v1160_v28 = vld [vmem:[#allocation5 + $0x78] sm:$0xff]  }
  0x40   :  { %983 = vmatprep.subr.bf16.mxu1 %v1141_v9  ;;  %v1157_v25 = vld [vmem:[#allocation5 + $0xf0] sm:$0xff]   ;;  %v1161_v29 = vld [vmem:[#allocation5 + $0xf8] sm:$0xff]   ;;  %v61_v32 = vld [vmem:[#allocation2] sm:$0xff] }
  0x41   :  { %v1158_v26 = vld [vmem:[#allocation5 + $0x30] sm:$0xff]   ;;  %v1162_v30 = vld [vmem:[#allocation5 + $0x38] sm:$0xff]   ;;  %v62_v33 = vld [vmem:[#allocation2 + $0x8] sm:$0xff]  ;;  %v884_v34 = vcombine.low %v61_v32, %v61_v32  ;;  %v885_v35 = vcombine.high %v61_v32, %v61_v32 }
  0x42   :  { %962 = vmatpush3.bf16.msra.mxu0 %v1142_v10  ;;  %v1159_v27 = vld [vmem:[#allocation5 + $0xb0] sm:$0xff]   ;;  %v1163_v31 = vld [vmem:[#allocation5 + $0xb8] sm:$0xff]   ;;  %v886_v36 = vcombine.low %v62_v33, %v62_v33  ;;  %v887_v37 = vcombine.high %v62_v33, %v62_v33  ;;  %v1168_v38 = vld [vmem:[#allocation5 + $0x140] sm:$0xff]  }
  0x43   :  { %984 = vmatpush3.bf16.msra.mxu1 %v1143_v11  ;;  %963 = vmatprep.subr.bf16.mxu0 %v1144_v12  ;;  %v1169_v39 = vld [vmem:[#allocation5 + $0x1c0] sm:$0xff]   ;;  %v1172_v42 = vld [vmem:[#allocation5 + $0x148] sm:$0xff]   ;;  %v1176_v46 = vld [vmem:[#allocation5 + $0x150] sm:$0xff]  }
  0x44   :  { %985 = vmatprep.subr.bf16.mxu1 %v1145_v13  ;;  %644 = vmatprep.mubr.bf16.mxu0 %v885_v35  ;;  %v1170_v40 = vld [vmem:[#allocation5 + $0x100] sm:$0xff]   ;;  %v1173_v43 = vld [vmem:[#allocation5 + $0x1c8] sm:$0xff]   ;;  %v1177_v47 = vld [vmem:[#allocation5 + $0x1d0] sm:$0xff]  }
  0x45   :  { %684 = vmatprep.mubr.bf16.mxu1 %v887_v37  ;;  %v1171_v41 = vld [vmem:[#allocation5 + $0x180] sm:$0xff]   ;;  %v1174_v44 = vld [vmem:[#allocation5 + $0x108] sm:$0xff]   ;;  %v1178_v48 = vld [vmem:[#allocation5 + $0x110] sm:$0xff]   ;;  %v1307_v37 = vmov 0.0  }
  0x46   :  { %964 = vmatpush3.bf16.msra.mxu0 %v1146_v14  ;;  %v1175_v45 = vld [vmem:[#allocation5 + $0x188] sm:$0xff]   ;;  %v1179_v49 = vld [vmem:[#allocation5 + $0x190] sm:$0xff]   ;;  %v1180_v50 = vld [vmem:[#allocation5 + $0x158] sm:$0xff]  }
  0x47   :  { %986 = vmatpush3.bf16.msra.mxu1 %v1147_v15  ;;  %965 = vmatprep.subr.bf16.mxu0 %v1148_v16  ;;  %v1181_v51 = vld [vmem:[#allocation5 + $0x1d8] sm:$0xff]   ;;  %v1184_v54 = vld [vmem:[#allocation5 + $0x160] sm:$0xff]   ;;  %v1188_v58 = vld [vmem:[#allocation5 + $0x168] sm:$0xff]   ;;  %v1305_v15 = vmov 0.0|0.0  }
  0x48   :  { %987 = vmatprep.subr.bf16.mxu1 %v1149_v17  ;;  %v1182_v52 = vld [vmem:[#allocation5 + $0x118] sm:$0xff]   ;;  %v1185_v55 = vld [vmem:[#allocation5 + $0x1e0] sm:$0xff]   ;;  %v1189_v59 = vld [vmem:[#allocation5 + $0x1e8] sm:$0xff]  }
  0x49   :  { %v1183_v53 = vld [vmem:[#allocation5 + $0x198] sm:$0xff]   ;;  %v1186_v56 = vld [vmem:[#allocation5 + $0x120] sm:$0xff]   ;;  %v1190_v60 = vld [vmem:[#allocation5 + $0x128] sm:$0xff]  }
  0x4a   :  { %966 = vmatpush3.bf16.msra.mxu0 %v1150_v18  ;;  %v1187_v57 = vld [vmem:[#allocation5 + $0x1a0] sm:$0xff]   ;;  %v1191_v61 = vld [vmem:[#allocation5 + $0x1a8] sm:$0xff]   ;;  %v1192_v62 = vld [vmem:[#allocation5 + $0x170] sm:$0xff]  }
  0x4b   :  { %988 = vmatpush3.bf16.msra.mxu1 %v1151_v19  ;;  %967 = vmatprep.subr.bf16.mxu0 %v1152_v20  ;;  %v1193_v63 = vld [vmem:[#allocation5 + $0x1f0] sm:$0xff]   ;;  %v1196_v2 = vld [vmem:[#allocation5 + $0x178] sm:$0xff]   ;;  %v773_v12 = vld [vmem:[#allocation7] sm:$0xff] }
  0x4c   :  { %989 = vmatprep.subr.bf16.mxu1 %v1153_v21  ;;  %v1194_v0 = vld [vmem:[#allocation5 + $0x130] sm:$0xff]   ;;  %v1197_v3 = vld [vmem:[#allocation5 + $0x1f8] sm:$0xff]   ;;  %v774_v13 = vld [vmem:[#allocation7 + $0x8] sm:$0xff] }
  0x4d   :  { %v1195_v1 = vld [vmem:[#allocation5 + $0x1b0] sm:$0xff]   ;;  %v1198_v4 = vld [vmem:[#allocation5 + $0x138] sm:$0xff]   ;;  %v1098_v16 = vpack.c.bf16 %v774_v13, %v773_v12  ;;  %v777_v19 = vld [vmem:[#allocation7 + $0x20] sm:$0xff] }
  0x4e   :  { %968 = vmatpush3.bf16.msra.mxu0 %v1154_v22  ;;  %v1199_v5 = vld [vmem:[#allocation5 + $0x1b8] sm:$0xff]   ;;  %v63_v6 = vld [vmem:[#allocation2 + $0x10] sm:$0xff]  ;;  %v778_v20 = vld [vmem:[#allocation7 + $0x28] sm:$0xff] }
  0x4f   :  { %990 = vmatpush3.bf16.msra.mxu1 %v1155_v23  ;;  %969 = vmatprep.subr.bf16.mxu0 %v1156_v24  ;;  %v888_v7 = vcombine.low %v63_v6, %v63_v6  ;;  %v889_v8 = vcombine.high %v63_v6, %v63_v6  ;;  %v64_v9 = vld [vmem:[#allocation2 + $0x18] sm:$0xff]  ;;  %v775_v14 = vld [vmem:[#allocation7 + $0x10] sm:$0xff]  ;;  %v1104_v21 = vpack.c.bf16 %v778_v20, %v777_v19  ;;  %v786_v32 = vld [vmem:[#allocation7 + $0x68] sm:$0xff] }
  0x50   :  { %991 = vmatprep.subr.bf16.mxu1 %v1157_v25  ;;  %v890_v10 = vcombine.low %v64_v9, %v64_v9  ;;  %v891_v11 = vcombine.high %v64_v9, %v64_v9  ;;  %v776_v17 = vld [vmem:[#allocation7 + $0x18] sm:$0xff]  ;;  %v779_v22 = vld [vmem:[#allocation7 + $0x30] sm:$0xff]  ;;  %v781_v25 = vld [vmem:[#allocation7 + $0x40] sm:$0xff] }
  0x51   :  { %v1101_v18 = vpack.c.bf16 %v776_v17, %v775_v14  ;;  %v780_v23 = vld [vmem:[#allocation7 + $0x38] sm:$0xff] }
  0x52   :  { %970 = vmatpush3.bf16.msra.mxu0 %v1158_v26  ;;  %v1107_v24 = vpack.c.bf16 %v780_v23, %v779_v22  ;;  %v782_v26 = vld [vmem:[#allocation7 + $0x48] sm:$0xff]  ;;  %v788_v35 = vld [vmem:[#allocation7 + $0x78] sm:$0xff] }
  0x53   :  { %992 = vmatpush3.bf16.msra.mxu1 %v1159_v27  ;;  %971 = vmatprep.subr.bf16.mxu0 %v1160_v28  ;;  %v1110_v27 = vpack.c.bf16 %v782_v26, %v781_v25  ;;  %v783_v28 = vld [vmem:[#allocation7 + $0x50] sm:$0xff] }
  0x54   :  { %993 = vmatprep.subr.bf16.mxu1 %v1161_v29  ;;  %v784_v29 = vld [vmem:[#allocation7 + $0x58] sm:$0xff] }
  0x56   :  { %972 = vmatpush3.bf16.msra.mxu0 %v1162_v30  ;;  %v1113_v30 = vpack.c.bf16 %v784_v29, %v783_v28 }
  0x57   :  { %994 = vmatpush3.bf16.msra.mxu1 %v1163_v31  ;;  %1001 = vmatprep.subr.bf16.mxu0 %v1168_v38  ;;  %v785_v31 = vld [vmem:[#allocation7 + $0x60] sm:$0xff] }
  0x58   :  { %1023 = vmatprep.subr.bf16.mxu1 %v1169_v39  ;;  %v1116_v33 = vpack.c.bf16 %v786_v32, %v785_v31 }
  0x59   :  { %645 = vmatmul.mubr.bf16.vlgmr.msra.gmra.mrb[0].mxu0 %v884_v34  ;;  %v787_v34 = vld [vmem:[#allocation7 + $0x70] sm:$0xff] }
  0x5a   :  { %685 = vmatmul.mubr.bf16.vlgmr.msra.gmra.mrb[0].mxu1 %v886_v36  ;;  %1002 = vmatpush3.bf16.msra.mxu0 %v1170_v40  ;;  %v1119_v36 = vpack.c.bf16 %v788_v35, %v787_v34  ;;  %v883_v40 = vld [vmem:[%s1395_s2] ss:$0 sm:$0xff] }
  0x5b   :  { %1024 = vmatpush3.bf16.msra.mxu1 %v1171_v41  ;;  %1003 = vmatprep.subr.bf16.mxu0 %v1172_v42 }
  0x5c   :  { %1025 = vmatprep.subr.bf16.mxu1 %v1173_v43  ;;  %724 = vmatprep.mubr.bf16.mxu0 %v889_v8 }
  0x5d   :  { %764 = vmatprep.mubr.bf16.mxu1 %v891_v11 }
  0x5e   :  { %1004 = vmatpush3.bf16.msra.mxu0 %v1174_v44 }
  0x5f   :  { %1026 = vmatpush3.bf16.msra.mxu1 %v1175_v45  ;;  %1005 = vmatprep.subr.bf16.mxu0 %v1176_v46 }
  0x60   :  { %1027 = vmatprep.subr.bf16.mxu1 %v1177_v47 }
  0x62   :  { %1006 = vmatpush3.bf16.msra.mxu0 %v1178_v48 }
  0x63   :  { %1028 = vmatpush3.bf16.msra.mxu1 %v1179_v49  ;;  %1007 = vmatprep.subr.bf16.mxu0 %v1180_v50 }
  0x64   :  { %1029 = vmatprep.subr.bf16.mxu1 %v1181_v51 }
  0x66   :  { %1008 = vmatpush3.bf16.msra.mxu0 %v1182_v52 }
  0x67   :  { %1030 = vmatpush3.bf16.msra.mxu1 %v1183_v53  ;;  %1009 = vmatprep.subr.bf16.mxu0 %v1184_v54 }
  0x68   :  { %1031 = vmatprep.subr.bf16.mxu1 %v1185_v55 }
  0x6a   :  { %1010 = vmatpush3.bf16.msra.mxu0 %v1186_v56 }
  0x6b   :  { %1032 = vmatpush3.bf16.msra.mxu1 %v1187_v57  ;;  %1011 = vmatprep.subr.bf16.mxu0 %v1188_v58 }
  0x6c   :  { %1033 = vmatprep.subr.bf16.mxu1 %v1189_v59 }
  0x6e   :  { %1012 = vmatpush3.bf16.msra.mxu0 %v1190_v60 }
  0x6f   :  { %1034 = vmatpush3.bf16.msra.mxu1 %v1191_v61  ;;  %1013 = vmatprep.subr.bf16.mxu0 %v1192_v62 }
  0x70   :  { %1035 = vmatprep.subr.bf16.mxu1 %v1193_v63 }
  0x72   :  { %1014 = vmatpush3.bf16.msra.mxu0 %v1194_v0  ;;  %v956_v0 = vld [vmem:[%s1397_s4] ss:$0 sm:$0xff] }
  0x73   :  { %1036 = vmatpush3.bf16.msra.mxu1 %v1195_v1  ;;  %1015 = vmatprep.subr.bf16.mxu0 %v1196_v2 }
  0x74   :  { %1037 = vmatprep.subr.bf16.mxu1 %v1197_v3 }
  0x76   :  { %1016 = vmatpush3.bf16.msra.mxu0 %v1198_v4 }
  0x77   :  { %1038 = vmatpush3.bf16.msra.mxu1 %v1199_v5  ;;  %1097 = vmatprep.subr.bf16.mxu0 %v1305_v15 }
  0x79   :  { %725 = vmatmul.mubr.bf16.vlgmr.msra.gmra.mrb[4].mxu0 %v888_v7 }
  0x7a   :  { %765 = vmatmul.mubr.bf16.vlgmr.msra.gmra.mrb[4].mxu1 %v890_v10  ;;  %1099 = vmatpush3.bf16.msra.mxu0 %v1098_v16 }
  0x7b   :  { %1100 = vmatprep.subr.bf16.mxu0 %v1305_v15  ;;  %1094 = vmatprep.mubr.msk.f32.mxu0 %vm1306_vm0, %v1307_v37 }
  0x7e   :  { %1102 = vmatpush3.bf16.msra.mxu0 %v1101_v18 }
  0x7f   :  { %1103 = vmatprep.subr.bf16.mxu0 %v1305_v15 }
  0x82   :  { %1105 = vmatpush3.bf16.msra.mxu0 %v1104_v21 }
  0x83   :  { %1106 = vmatprep.subr.bf16.mxu0 %v1305_v15 }
  0x86   :  { %1108 = vmatpush3.bf16.msra.mxu0 %v1107_v24 }
  0x87   :  { %1109 = vmatprep.subr.bf16.mxu0 %v1305_v15 }
  0x8a   :  { %1111 = vmatpush3.bf16.msra.mxu0 %v1110_v27 }
  0x8b   :  { %1112 = vmatprep.subr.bf16.mxu0 %v1305_v15 }
  0x8e   :  { %1114 = vmatpush3.bf16.msra.mxu0 %v1113_v30 }
  0x8f   :  { %1115 = vmatprep.subr.bf16.mxu0 %v1305_v15 }
  0x92   :  { %1117 = vmatpush3.bf16.msra.mxu0 %v1116_v33 }
  0x93   :  { %1118 = vmatprep.subr.bf16.mxu0 %v1305_v15 }
  0x96   :  { %1120 = vmatpush3.bf16.msra.mxu0 %v1119_v36 }
 0x12c   :  { %v973_v38 = vpop.f32.mrb[0].mxu0 }
 0x12d   :  { %v995_v39 = vpop.f32.mrb[0].mxu1  ;;  %v974_v41 = vpop.f32.mrb[1].mxu0 }
 0x12e   :  { %v996_v42 = vpop.f32.mrb[1].mxu1  ;;  %v975_v43 = vadd.f32 %v974_v41, %v973_v38  ;;  %v976_v45 = vpop.f32.mrb[2].mxu0 }
 0x12f   :  { %v997_v44 = vadd.f32 %v996_v42, %v995_v39  ;;  %v998_v46 = vpop.f32.mrb[2].mxu1  ;;  %v977_v47 = vpop.f32.mrb[3].mxu0 }
 0x130   :  { %v999_v48 = vpop.f32.mrb[3].mxu1  ;;  %v647_v49 = vadd.f32 %v975_v43, %v883_v40 }
 0x132   :  { %v687_v50 = vadd.f32 %v997_v44, %v647_v49 }
 0x14c   :  { %v1017_v51 = vpop.f32.mrb[4].mxu0 }
 0x14d   :  { %v1039_v52 = vpop.f32.mrb[4].mxu1  ;;  %v1018_v53 = vpop.f32.mrb[5].mxu0 }
 0x14e   :  { %v1040_v54 = vpop.f32.mrb[5].mxu1  ;;  %v1019_v55 = vadd.f32 %v1018_v53, %v1017_v51  ;;  %v1020_v57 = vpop.f32.mrb[6].mxu0 }
 0x14f   :  { %v1041_v56 = vadd.f32 %v1040_v54, %v1039_v52  ;;  %v1042_v58 = vpop.f32.mrb[6].mxu1  ;;  %v1021_v59 = vpop.f32.mrb[7].mxu0 }
 0x150   :  { %v1043_v60 = vpop.f32.mrb[7].mxu1  ;;  %v727_v61 = vadd.f32 %v1019_v55, %v687_v50 }
 0x152   :  { %v767_v62 = vadd.f32 %v1041_v56, %v727_v61 }
 0x154   :  { %v772_v63 = vmax.f32 %v767_v62, 0.0 }
 0x156   :  { %1095 = vmatmul.mubr.f32.vlgmr.msra.gmra.mrb[8].mxu0 %v772_v63 }
 0x229   :  { %v862_v1 = vpop.f32.mrb[8].mxu0 }
 0x22a   :  { %v863_v2 = vadd.f32 %v956_v0, %v862_v1  ;;  %v1096_v3 = vpop.f32.mrb[9].mxu0 }
 0x22c   :  { %866 = vst [vmem:[#allocation8] sm:$0xff] %v863_v2 }
 0x22d   :  { %1281 = shalt.err (!%p1278_p0)
}
 0x22e   :  { %s1282_s13 = scalar_lea.hbm %s1398_s5, 128 }
 0x22f   :  { %p1283_p1 = scmp.ne.s32.totalorder %s1398_s5, %s1282_s13  ;;  %p1286_p2 = scmp.lt.u32.totalorder %s1282_s13, %s1398_s5 }
 0x231   :  { %p1288_p3 = pnand %p1286_p2, %p1283_p1 }
 0x233   :  { %1291 = shalt.err (!%p1288_p3)
}
 0x234   :  { %876 = dma.vmem_to_hbm [thread:$0]  %s874_s9, 128, %s1398_s5, [#allocation4]  }
 0x235   :  { %1296 = dma.done.wait [#allocation4], 128  }
 0x236   :  { %1297 = vsyncadd [#allocation4], 4294967168 }
 0x237   :  { %880 = vsyncpa [#allocation3], 1 }
 0x238   :  { %881 = vsyncpa [#allocation6], 1 }
 0x239   :  { %882 = vsyncpa [#allocation4], 1 }

</bundles_post_ra>
